<compile_context>
chip_gen: v7x
topology: tpu7x:2x2x1
jax: 0.10.0
libtpu: 0.0.40
codegen_flags: <defaults>
</compile_context>

<pallas_src>
import math

import jax
import jax.numpy as jnp
from jax.experimental import pallas as pl
from jax.experimental.pallas import tpu as pltpu

IN_F = 20
HID_F = 256
OUT_F = 10
OUT_F_PAD = 128  # pad the 10 output features to one full vreg lane width


def mlp_kernel(x_ref, w1_ref, b1_ref, w2_ref, b2_ref, o_ref):
    # In-kernel f32 -> bf16 cast of X (VPU, free under the HBM/DMA slack).
    x = x_ref[...].astype(jnp.bfloat16)
    # Hidden layer: (TB, 20)bf16 @ (20, 256)bf16 -> f32 accumulate on the MXU.
    h = jnp.dot(x, w1_ref[...], preferred_element_type=jnp.float32)
    h = jnp.maximum(h + b1_ref[...], 0.0)  # bias + ReLU in f32 on the VPU
    # Output layer: cast hidden to bf16 for native-rate MXU, f32 accumulate.
    y = jnp.dot(h.astype(w2_ref.dtype), w2_ref[...],
                preferred_element_type=jnp.float32)
    # Lane-dense (TB, 128) store, rounded to bf16 only at the final write.
    o_ref[...] = (y + b2_ref[...]).astype(o_ref.dtype)


def _round_up(n, m):
    return ((n + m - 1) // m) * m


def mlp_forward(x, w1, b1, w2, b2, *, tb_max=4096):
    """x: (B, 20) f32; w1: (20, 256); b1: (256,); w2: (256, 10); b2: (10,).
    Returns relu(x @ w1 + b1) @ w2 + b2 with shape (B, 10), f32."""
    B = x.shape[0]

    # Pad batch only to a multiple of 16 (bf16 sublane pack), then pick a tile size
    # that divides the grid with at most one sublane tile of waste.
    b_pad16 = _round_up(B, 16)
    num_steps = max(1, pl.cdiv(b_pad16, tb_max))
    if b_pad16 > 2048:
        # v7x dual-TC: keep >= 2 grid steps so "parallel" can actually shard the batch.
        num_steps = max(num_steps, 2)
    TB = _round_up(pl.cdiv(b_pad16, num_steps), 16)
    B_pad = num_steps * TB
    if B_pad != B:
        x = jnp.pad(x, ((0, B_pad - B), (0, 0)))

    # Weights in bf16 (dominant MXU streams); biases stay f32.
    w1_bf = w1.astype(jnp.bfloat16)
    # Lane-dense output: zero-pad W2 / b2 from 10 -> 128 columns.
    w2_pad = jnp.zeros((HID_F, OUT_F_PAD), jnp.float32).at[:, :OUT_F].set(w2)
    b2_pad = jnp.zeros((OUT_F_PAD,), jnp.float32).at[:OUT_F].set(b2)
    w2_bf = w2_pad.astype(jnp.bfloat16)

    out = pl.pallas_call(
        mlp_kernel,
        out_shape=jax.ShapeDtypeStruct((B_pad, OUT_F_PAD), jnp.bfloat16),
        grid=(num_steps,),
        in_specs=[
            pl.BlockSpec((TB, IN_F), lambda i: (i, 0)),          # X (f32): tiled on batch
            pl.BlockSpec((IN_F, HID_F), lambda i: (0, 0)),       # W1: VMEM-resident
            pl.BlockSpec((1, HID_F), lambda i: (0, 0)),          # b1
            pl.BlockSpec((HID_F, OUT_F_PAD), lambda i: (0, 0)),  # W2 (padded, resident)
            pl.BlockSpec((1, OUT_F_PAD), lambda i: (0, 0)),      # b2 (padded)
        ],
        out_specs=pl.BlockSpec((TB, OUT_F_PAD), lambda i: (i, 0)),
        compiler_params=pltpu.CompilerParams(
            dimension_semantics=("parallel",)),
    )(x, w1_bf, b1.reshape(1, HID_F), w2_bf, b2_pad.reshape(1, OUT_F_PAD))

    # Slice off batch padding + lane padding; give callers f32 like the PyTorch module.
    return out[:B, :OUT_F].astype(jnp.float32)


def mlp_reference(x, w1, b1, w2, b2):
    """Pure-JAX reference with the same numerics (bf16 matmuls, f32 accumulate,
    bf16 rounding at the final store)."""
    h = jnp.dot(x.astype(jnp.bfloat16), w1.astype(jnp.bfloat16),
                preferred_element_type=jnp.float32)
    h = jnp.maximum(h + b1, 0.0)
    y = jnp.dot(h.astype(jnp.bfloat16), w2.astype(jnp.bfloat16),
                preferred_element_type=jnp.float32)
    return (y + b2).astype(jnp.bfloat16).astype(jnp.float32)


def init_params(key):
    """Mimics torch.nn.Linear default init (uniform(-1/sqrt(fan_in), 1/sqrt(fan_in))).
    Weights stored (in, out), i.e. already transposed vs. PyTorch's (out, in)."""
    k1, k2, k3, k4 = jax.random.split(key, 4)
    bound1 = 1.0 / math.sqrt(IN_F)
    bound2 = 1.0 / math.sqrt(HID_F)
    w1 = jax.random.uniform(k1, (IN_F, HID_F), jnp.float32, -bound1, bound1)
    b1 = jax.random.uniform(k2, (HID_F,), jnp.float32, -bound1, bound1)
    w2 = jax.random.uniform(k3, (HID_F, OUT_F), jnp.float32, -bound2, bound2)
    b2 = jax.random.uniform(k4, (OUT_F,), jnp.float32, -bound2, bound2)
    return w1, b1, w2, b2


if __name__ == "__main__":
    key = jax.random.PRNGKey(0)
    kx, kp = jax.random.split(key)
    B = 8
    x = jax.random.normal(kx, (B, IN_F), jnp.float32)
    w1, b1, w2, b2 = init_params(kp)

    out = jax.block_until_ready(mlp_forward(x, w1, b1, w2, b2))
    ref = mlp_reference(x, w1, b1, w2, b2)
    assert out.shape == (B, OUT_F)
    assert jnp.allclose(out, ref, atol=2e-2, rtol=2e-2), (
        f"max abs err {jnp.max(jnp.abs(out - ref))}")

    # Batch not a multiple of 16 -> exercises the padding path.
    x2 = jax.random.normal(jax.random.PRNGKey(1), (13, IN_F), jnp.float32)
    out2 = jax.block_until_ready(mlp_forward(x2, w1, b1, w2, b2))
    ref2 = mlp_reference(x2, w1, b1, w2, b2)
    assert out2.shape == (13, OUT_F)
    assert jnp.allclose(out2, ref2, atol=2e-2, rtol=2e-2)

    # Force a multi-step grid (small tb_max) to exercise the pipelined batch loop.
    x3 = jax.random.normal(jax.random.PRNGKey(2), (100, IN_F), jnp.float32)
    out3 = jax.block_until_ready(mlp_forward(x3, w1, b1, w2, b2, tb_max=32))
    ref3 = mlp_reference(x3, w1, b1, w2, b2)
    assert out3.shape == (100, OUT_F)
    assert jnp.allclose(out3, ref3, atol=2e-2, rtol=2e-2)

    print("KERNEL_OK")
</pallas_src>

<mosaic_0001>
module attributes {stable_mosaic.version = 11 : i64} {
  func.func @mlp_kernel(%arg0: i32, %arg1: memref<16x20xf32, #tpu.memory_space<vmem>>, %arg2: memref<20x256xbf16, #tpu.memory_space<vmem>>, %arg3: memref<1x256xf32, #tpu.memory_space<vmem>>, %arg4: memref<256x128xbf16, #tpu.memory_space<vmem>>, %arg5: memref<1x128xf32, #tpu.memory_space<vmem>>, %arg6: memref<16x128xbf16, #tpu.memory_space<vmem>>) attributes {dimension_semantics = [#tpu.dimension_semantics<parallel>], iteration_bounds = array<i64: 1>, scalar_prefetch = 0 : i64, scratch_operands = 0 : i64, tpu.core_type = #tpu.core_type<tc>, window_params = [{transform_indices = @transform_0, window_bounds = array<i64: 16, 20>}, {pipeline_mode = #tpu.pipeline_mode<synchronous>, transform_indices = @transform_1, window_bounds = array<i64: 20, 256>}, {pipeline_mode = #tpu.pipeline_mode<synchronous>, transform_indices = @transform_2, window_bounds = array<i64: 1, 256>}, {pipeline_mode = #tpu.pipeline_mode<synchronous>, transform_indices = @transform_3, window_bounds = array<i64: 256, 128>}, {pipeline_mode = #tpu.pipeline_mode<synchronous>, transform_indices = @transform_4, window_bounds = array<i64: 1, 128>}, {transform_indices = @transform_5, window_bounds = array<i64: 16, 128>}]} {
    %c0 = arith.constant 0 : index
    %c0_0 = arith.constant 0 : index
    %0 = vector.load %arg1[%c0, %c0_0] : memref<16x20xf32, #tpu.memory_space<vmem>>, vector<16x20xf32>
    %1 = arith.truncf %0 : vector<16x20xf32> to vector<16x20xbf16>
    %c0_1 = arith.constant 0 : index
    %c0_2 = arith.constant 0 : index
    %2 = vector.load %arg2[%c0_1, %c0_2] : memref<20x256xbf16, #tpu.memory_space<vmem>>, vector<20x256xbf16>
    %cst = arith.constant dense<0.000000e+00> : vector<16x256xf32>
    %3 = tpu.matmul %1, %2, %cst {dimension_numbers = #tpu.dot_dimension_numbers<[1], [0], [0], [1], [0, 0, 1, 1], [], []>} : vector<16x20xbf16>, vector<20x256xbf16>, vector<16x256xf32> -> vector<16x256xf32>
    %c0_3 = arith.constant 0 : index
    %c0_4 = arith.constant 0 : index
    %4 = vector.load %arg3[%c0_3, %c0_4] : memref<1x256xf32, #tpu.memory_space<vmem>>, vector<1x256xf32>
    %5 = vector.broadcast %4 : vector<1x256xf32> to vector<16x256xf32>
    %6 = arith.addf %3, %5 : vector<16x256xf32>
    %cst_5 = arith.constant 0.000000e+00 : f32
    %7 = vector.broadcast %cst_5 : f32 to vector<16x256xf32>
    %8 = arith.maximumf %6, %7 : vector<16x256xf32>
    %9 = arith.truncf %8 : vector<16x256xf32> to vector<16x256xbf16>
    %c0_6 = arith.constant 0 : index
    %c0_7 = arith.constant 0 : index
    %10 = vector.load %arg4[%c0_6, %c0_7] : memref<256x128xbf16, #tpu.memory_space<vmem>>, vector<256x128xbf16>
    %cst_8 = arith.constant dense<0.000000e+00> : vector<16x128xf32>
    %11 = tpu.matmul %9, %10, %cst_8 {dimension_numbers = #tpu.dot_dimension_numbers<[1], [0], [0], [1], [0, 0, 1, 1], [], []>} : vector<16x256xbf16>, vector<256x128xbf16>, vector<16x128xf32> -> vector<16x128xf32>
    %c0_9 = arith.constant 0 : index
    %c0_10 = arith.constant 0 : index
    %12 = vector.load %arg5[%c0_9, %c0_10] : memref<1x128xf32, #tpu.memory_space<vmem>>, vector<1x128xf32>
    %13 = vector.broadcast %12 : vector<1x128xf32> to vector<16x128xf32>
    %14 = arith.addf %11, %13 : vector<16x128xf32>
    %15 = arith.truncf %14 : vector<16x128xf32> to vector<16x128xbf16>
    %c0_11 = arith.constant 0 : index
    %c0_12 = arith.constant 0 : index
    %16 = vector.load %arg6[%c0_11, %c0_12] : memref<16x128xbf16, #tpu.memory_space<vmem>>, vector<16x128xbf16>
    tpu.vector_store %arg6[%c0_11, %c0_12], %15 {strides = array<i32>} : memref<16x128xbf16, #tpu.memory_space<vmem>>, vector<16x128xbf16>,
    return
  }
  func.func @transform_0(%arg0: i32) -> (i32, i32) {
    %c0_i32 = arith.constant 0 : i32
    %c0_i32_0 = arith.constant 0 : i32
    return %arg0, %c0_i32 : i32, i32
  }
  func.func @transform_1(%arg0: i32) -> (i32, i32) {
    %c0_i32 = arith.constant 0 : i32
    %c0_i32_0 = arith.constant 0 : i32
    %c0_i32_1 = arith.constant 0 : i32
    return %c0_i32, %c0_i32_0 : i32, i32
  }
  func.func @transform_2(%arg0: i32) -> (i32, i32) {
    %c0_i32 = arith.constant 0 : i32
    %c0_i32_0 = arith.constant 0 : i32
    %c0_i32_1 = arith.constant 0 : i32
    return %c0_i32, %c0_i32_0 : i32, i32
  }
  func.func @transform_3(%arg0: i32) -> (i32, i32) {
    %c0_i32 = arith.constant 0 : i32
    %c0_i32_0 = arith.constant 0 : i32
    %c0_i32_1 = arith.constant 0 : i32
    return %c0_i32, %c0_i32_0 : i32, i32
  }
  func.func @transform_4(%arg0: i32) -> (i32, i32) {
    %c0_i32 = arith.constant 0 : i32
    %c0_i32_0 = arith.constant 0 : i32
    %c0_i32_1 = arith.constant 0 : i32
    return %c0_i32, %c0_i32_0 : i32, i32
  }
  func.func @transform_5(%arg0: i32) -> (i32, i32) {
    %c0_i32 = arith.constant 0 : i32
    %c0_i32_0 = arith.constant 0 : i32
    return %arg0, %c0_i32 : i32, i32
  }
}

</mosaic_0001>

<bundles_post_ra>
// kernel: tpu_custom_call.1
= control target key start
LH: loop header
LB: loop body
LE: loop exit
PB: predicated region body
PF: predicated region fallthrough
CT: control target
= control target key end

     0   :  { %10 = vsyncpa [#allocation3], 0  ;;  %s644_s0 = inlined_call_operand.hbm [shape: f32[16,20], index: 0, kind: input, shape index: {}]   ;;  %s645_s1 = inlined_call_operand.hbm [shape: bf16[20,256], index: 1, kind: input, shape index: {}]   ;;  %s646_s2 = inlined_call_operand.vmem [shape: f32[1,256], index: 2, kind: input, shape index: {}]   ;;  %s647_s3 = inlined_call_operand.hbm [shape: bf16[256,128], index: 3, kind: input, shape index: {}]   ;;  %s648_s4 = inlined_call_operand.vmem [shape: f32[1,128], index: 4, kind: input, shape index: {}]   ;;  %s649_s5 = inlined_call_operand.hbm [shape: bf16[16,128], index: 5, kind: output, shape index: {}]  }
   0x1   :  { %11 = vsyncpa [#allocation6], 0 }
   0x2   :  { %12 = vsyncpa [#allocation4], 0  ;;  %s538_s18 = smov [#allocation5]   ;;  %s539_s20 = smov [#allocation2]  }
   0x3   :  { %s30_s19 = sshll.u32 %s538_s18, 4  ;;  %s18_s21 = sshll.u32 %s539_s20, 4  ;;  %s31_s19 = int_to_ptr.vmem [resolvable:$true] %s30_s19  ;;  %s577_s21 = int_to_ptr.vmem [resolvable:$true] %s18_s21 }
   0x4   :  { %s444_s24 = scalar_lea.hbm %s645_s1, 384 }
   0x5   :  { %p445_p0 = scmp.ne.s32.totalorder %s645_s1, %s444_s24  ;;  %p448_p1 = scmp.lt.u32.totalorder %s444_s24, %s645_s1 }
   0x7   :  { %p450_p2 = pnand %p448_p1, %p445_p0 }
   0x9   :  { %453 = shalt.err (!%p450_p2)
}
   0xa   :  { %s454_s29 = scalar_lea.vmem %s31_s19, 384  ;;  %p459_p4 = scmp.lt.s32.totalorder %s31_s19, %s31_s19 }
   0xb   :  { %p455_p3 = scmp.ne.s32.totalorder %s31_s19, %s454_s29  ;;  %p460_p5 = scmp.lt.s32.totalorder %s454_s29, %s454_s29 }
   0xd   :  { %p461_p6 = por %p460_p5, %p459_p4 }
   0xf   :  { %p462_p7 = pnand %p461_p6, %p455_p3 }
  0x11   :  { %465 = shalt.err (!%p462_p7)
}
  0x12   :  { %s540_s30 = smov 128   ;;  %s541_s6 = smov 8  }
  0x13   :  { %36 = dma.hbm_to_vmem [thread:$0]  %s645_s1, 384, %s31_s19, [#allocation6], %s540_s30, %s540_s30, %s541_s6  }
  0x14   :  { %s466_s11 = scalar_lea.hbm %s644_s0, 256 }
  0x15   :  { %p467_p8 = scmp.ne.s32.totalorder %s644_s0, %s466_s11  ;;  %p470_p9 = scmp.lt.u32.totalorder %s466_s11, %s644_s0 }
  0x17   :  { %p472_p10 = pnand %p470_p9, %p467_p8 }
  0x19   :  { %475 = shalt.err (!%p472_p10)
}
  0x1a   :  { %s476_s16 = scalar_lea.vmem %s577_s21, 256  ;;  %p481_p12 = scmp.lt.s32.totalorder %s577_s21, %s577_s21 }
  0x1b   :  { %p477_p11 = scmp.ne.s32.totalorder %s577_s21, %s476_s16  ;;  %p482_p13 = scmp.lt.s32.totalorder %s476_s16, %s476_s16 }
  0x1d   :  { %p483_p0 = por %p482_p13, %p481_p12 }
  0x1f   :  { %p484_p1 = pnand %p483_p0, %p477_p11 }
  0x21   :  { %487 = shalt.err (!%p484_p1)
}
  0x22   :  { %24 = dma.hbm_to_vmem [thread:$0]  %s644_s0, 256, %s577_s21, [#allocation3], %s540_s30, %s540_s30, %s541_s6  }
  0x23   :  { %s542_s18 = smov [#allocation7]   ;;  %s488_s23 = scalar_lea.hbm %s647_s3, 2048 }
  0x24   :  { %s44_s19 = sshll.u32 %s542_s18, 4  ;;  %p489_p2 = scmp.ne.s32.totalorder %s647_s3, %s488_s23  ;;  %s45_s19 = int_to_ptr.vmem [resolvable:$true] %s44_s19 }
  0x25   :  { %p492_p3 = scmp.lt.u32.totalorder %s488_s23, %s647_s3 }
  0x27   :  { %p494_p4 = pnand %p492_p3, %p489_p2 }
  0x29   :  { %497 = shalt.err (!%p494_p4)
}
  0x2a   :  { %s498_s28 = scalar_lea.vmem %s45_s19, 2048  ;;  %p503_p6 = scmp.lt.s32.totalorder %s45_s19, %s45_s19 }
  0x2b   :  { %p499_p5 = scmp.ne.s32.totalorder %s45_s19, %s498_s28  ;;  %p504_p7 = scmp.lt.s32.totalorder %s498_s28, %s498_s28 }
  0x2d   :  { %p505_p8 = por %p504_p7, %p503_p6 }
  0x2f   :  { %p506_p9 = pnand %p505_p8, %p499_p5 }
  0x31   :  { %509 = shalt.err (!%p506_p9)
}
  0x32   :  { %s543_s0 = smov 64   ;;  %s544_s21 = smov 4  }
  0x33   :  { %50 = dma.hbm_to_vmem [thread:$0]  %s647_s3, 2048, %s45_s19, [#allocation6], %s543_s0, %s543_s0, %s544_s21  }
  0x34   :  { %532 = dma.done.wait [#allocation3], 256  }
  0x35   :  { %533 = vsyncadd [#allocation3], 4294967040 }
  0x36   :  { %534 = dma.done.wait [#allocation6], 2432  }
  0x37   :  { %535 = vsyncadd [#allocation6], 4294964864  ;;  %v545_v0 = vmov 0   ;;  %v423_v1 = vld [vmem:[#allocation5 + $0x4] ss:$8 sps:$4 sm:$0xff]   ;;  %vm100_vm0 = vcmask 1041408   ;;  %v71_v26 = vlaneseq }
  0x38   :  { %139 = vmatprep.mubr.bf16.mxu0 %v545_v0  ;;  %v425_v2 = vld [vmem:[#allocation5] ss:$8 sps:$4 sm:$0xff]   ;;  %v68_v3 = vld [vmem:[#allocation5 + $0x10] sm:$0x33]  ;;  %107 = vmatprep.subr.bf16.mxu0 %v423_v1  ;;  %v64_v7 = vld [vmem:[#allocation2 + $0x8] sm:$0xff]  ;;  %vm96_vm1 = vcmask 162816  }
  0x39   :  { %v63_v4 = vld [vmem:[#allocation2] sm:$0xff]  ;;  %v363_v5 = vcombine.high %v68_v3, %v68_v3  ;;  %v362_v6 = vcombine.low %v68_v3, %v68_v3  ;;  %108 = vmatpush1.bf16.msra.mxu0 %v425_v2  ;;  %v428_v8 = vld [vmem:[#allocation7 + $0x40] sm:$0xff]   ;;  %v430_v11 = vld [vmem:[#allocation7 + $0x48] sm:$0xff]   ;;  %v72_v27 = vshrl.u32 %v71_v26, 7  ;;  %s546_s8 = smov [#allocation8]  }
  0x3a   :  { %v429_v10 = vld [vmem:[#allocation7] sm:$0xff]   ;;  %392 = vmatprep.subr.bf16.mxu1 %v428_v8  ;;  %v65_v12 = vpack.c.bf16 %v64_v7, %v63_v4  ;;  %v431_v13 = vld [vmem:[#allocation7 + $0x8] sm:$0xff]   ;;  %v432_v14 = vld [vmem:[#allocation7 + $0x50] sm:$0xff]   ;;  %s347_s9 = sshll.u32 %s546_s8, 4  ;;  %s348_s9 = int_to_ptr.vmem [resolvable:$true] %s347_s9 }
  0x3b   :  { %364 = vmatprep.subr.msk.bf16.mxu0 %vm100_vm0, %v363_v5  ;;  %v102_v9 = vsel %vm100_vm0, %v362_v6, 0  ;;  %393 = vmatpush3.bf16.msra.mxu1 %v429_v10  ;;  %v433_v15 = vld [vmem:[#allocation7 + $0x10] sm:$0xff]   ;;  %v434_v16 = vld [vmem:[#allocation7 + $0x58] sm:$0xff]   ;;  %v436_v18 = vld [vmem:[#allocation7 + $0x60] sm:$0xff]   ;;  %v73_v28 = vsub.s32 0, %v72_v27  ;;  %v77_v30 = vsub.s32 1, %v72_v27  ;;  %p515_p11 = scmp.lt.s32.totalorder %s348_s9, %s348_s9 }
  0x3c   :  { %394 = vmatprep.subr.bf16.mxu1 %v430_v11  ;;  %v435_v17 = vld [vmem:[#allocation7 + $0x18] sm:$0xff]   ;;  %v437_v19 = vld [vmem:[#allocation7 + $0x20] sm:$0xff]   ;;  %v438_v20 = vld [vmem:[#allocation7 + $0x68] sm:$0xff]   ;;  %s510_s10 = scalar_lea.vmem %s348_s9, 128 }
  0x3d   :  { %110 = vmatpush1.bf16.msra.mxu0 %v102_v9  ;;  %v439_v21 = vld [vmem:[#allocation7 + $0x28] sm:$0xff]   ;;  %v440_v22 = vld [vmem:[#allocation7 + $0x70] sm:$0xff]   ;;  %v442_v24 = vld [vmem:[#allocation7 + $0x78] sm:$0xff]   ;;  %p511_p10 = scmp.ne.s32.totalorder %s348_s9, %s510_s10  ;;  %p516_p12 = scmp.lt.s32.totalorder %s510_s10, %s510_s10 }
  0x3e   :  { %v441_v23 = vld [vmem:[#allocation7 + $0x30] sm:$0xff]   ;;  %v443_v25 = vld [vmem:[#allocation7 + $0x38] sm:$0xff]  }
  0x3f   :  { %395 = vmatpush3.bf16.msra.mxu1 %v431_v13  ;;  %v69_v29 = vld [vmem:[%s646_s2] sm:$0x3]  ;;  %p517_p13 = por %p516_p12, %p515_p11 }
  0x40   :  { %365 = vmatmul.mubr.msk.bf16.vlgmr.msra.gmra.mrb[0].mxu0 %vm96_vm1, %v65_v12  ;;  %396 = vmatprep.subr.bf16.mxu1 %v432_v14  ;;  %v74_v31 = vrot.slane %v69_v29, %v73_v28  ;;  %v78_v32 = vrot.slane %v69_v29, %v77_v30  ;;  %v366_v51 = vld [vmem:[%s648_s4] ss:$0 sm:$0xff] }
  0x41   :  { %p518_p0 = pnand %p517_p13, %p511_p10 }
  0x43   :  { %397 = vmatpush3.bf16.msra.mxu1 %v433_v15 }
  0x44   :  { %398 = vmatprep.subr.bf16.mxu1 %v434_v16 }
  0x47   :  { %399 = vmatpush3.bf16.msra.mxu1 %v435_v17 }
  0x48   :  { %400 = vmatprep.subr.bf16.mxu1 %v436_v18 }
  0x4b   :  { %401 = vmatpush3.bf16.msra.mxu1 %v437_v19 }
  0x4c   :  { %402 = vmatprep.subr.bf16.mxu1 %v438_v20 }
  0x4f   :  { %403 = vmatpush3.bf16.msra.mxu1 %v439_v21 }
  0x50   :  { %404 = vmatprep.subr.bf16.mxu1 %v440_v22 }
  0x53   :  { %405 = vmatpush3.bf16.msra.mxu1 %v441_v23 }
  0x54   :  { %406 = vmatprep.subr.bf16.mxu1 %v442_v24 }
  0x57   :  { %407 = vmatpush3.bf16.msra.mxu1 %v443_v25 }
 0x113   :  { %v141_v33 = vpop.f32.mrb[0].mxu0 }
 0x114   :  { %v142_v34 = vadd.f32 %v141_v33, %v74_v31  ;;  %v143_v35 = vpop.f32.mrb[1].mxu0 }
 0x115   :  { %v144_v36 = vadd.f32 %v143_v35, %v78_v32  ;;  %v145_v37 = vpop.f32.mrb[2].mxu0 }
 0x116   :  { %v146_v38 = vadd.f32 %v145_v37, %v74_v31  ;;  %v147_v39 = vpop.f32.mrb[3].mxu0  ;;  %v150_v41 = vmax.f32 %v142_v34, 0.0 }
 0x117   :  { %v148_v40 = vadd.f32 %v147_v39, %v78_v32  ;;  %v151_v43 = vmax.f32 %v144_v36, 0.0 }
 0x118   :  { %v152_v42 = vmax.f32 %v146_v38, 0.0 }
 0x119   :  { %v153_v44 = vmax.f32 %v148_v40, 0.0 }
 0x11a   :  { %v154_v45 = vpack.c.bf16 %v152_v42, %v150_v41 }
 0x11b   :  { %v155_v46 = vpack.c.bf16 %v153_v44, %v151_v43 }
 0x11d   :  { %323 = vmatprep.mubr.bf16.mxu1 %v155_v46 }
 0x11e   :  { %324 = vmatmul.mubr.bf16.vlgmr.msra.gmra.mrb[0].mxu1 %v154_v45 }
 0x1f1   :  { %v408_v47 = vpop.f32.mrb[0].mxu1 }
 0x1f2   :  { %v409_v48 = vpop.f32.mrb[1].mxu1 }
 0x1f3   :  { %v410_v49 = vadd.f32 %v409_v48, %v408_v47  ;;  %v411_v50 = vpop.f32.mrb[2].mxu1 }
 0x1f4   :  { %v412_v52 = vpop.f32.mrb[3].mxu1 }
 0x1f5   :  { %v413_v53 = vadd.f32 %v412_v52, %v411_v50  ;;  %v326_v54 = vadd.f32 %v410_v49, %v366_v51 }
 0x1f7   :  { %v329_v55 = vadd.f32 %v413_v53, %v366_v51 }
 0x1f9   :  { %v390_v56 = vpack.c.bf16 %v329_v55, %v326_v54 }
 0x1fb   :  { %391 = vst [vmem:[#allocation8] sm:$0xff] %v390_v56  }
 0x1fc   :  { %521 = shalt.err (!%p518_p0)
}
 0x1fd   :  { %s522_s4 = scalar_lea.hbm %s649_s5, 128 }
 0x1fe   :  { %p523_p1 = scmp.ne.s32.totalorder %s649_s5, %s522_s4  ;;  %p526_p2 = scmp.lt.u32.totalorder %s522_s4, %s649_s5 }
 0x200   :  { %p528_p3 = pnand %p526_p2, %p523_p1 }
 0x202   :  { %531 = shalt.err (!%p528_p3)
}
 0x203   :  { %353 = dma.vmem_to_hbm [thread:$0]  %s348_s9, 128, %s649_s5, [#allocation4], %s543_s0, %s543_s0, %s544_s21  }
 0x204   :  { %536 = dma.done.wait [#allocation4], 128  }
 0x205   :  { %537 = vsyncadd [#allocation4], 4294967168 }
 0x206   :  { %357 = vsyncpa [#allocation3], 1 }
 0x207   :  { %358 = vsyncpa [#allocation6], 1 }
 0x208   :  { %359 = vsyncpa [#allocation4], 1 }

</bundles_post_ra>
